<compile_context>
chip_gen: v6e
topology: v6e:2x2x1
jax: 0.10.0
libtpu: 0.0.40
codegen_flags: <defaults>
</compile_context>

<pallas_src>
import math
from functools import partial

import jax
import jax.numpy as jnp
from jax.experimental import pallas as pl
from jax.experimental.pallas import tpu as pltpu


# ----------------------------------------------------------------------------
# Block-size heuristic: target 4 grid steps (2 per v7x TensorCore -> DMA/compute
# overlap per core) while keeping lane-dense multiples of 128; falls back to
# 2 steps / full extent.  Per-step overhead ~0.35 us is negligible here.
# ----------------------------------------------------------------------------

def _pick_block(n, target_steps=4):
    for steps in (target_steps, 2):
        if n % steps == 0 and (n // steps) % 128 == 0:
            return n // steps
    return n


def _const_spec(arr):
    nd = arr.ndim
    return pl.BlockSpec(arr.shape, lambda i, _nd=nd: (0,) * _nd)


# ----------------------------------------------------------------------------
# Kernel 1: conv-as-matmul (lane-dense, bf16 MXU) + bias + LeakyReLU
# ----------------------------------------------------------------------------

def _conv_mm_kernel(p_ref, w_ref, b_ref, o_ref):
    # p_ref: (C*9, TB) bf16 patches (tokens in lanes); w_ref: (Cout, C*9) bf16
    y = jnp.dot(w_ref[...], p_ref[...], preferred_element_type=jnp.float32)
    y = y + b_ref[...]                                    # (Cout, 1) broadcast over lanes
    o_ref[...] = jnp.where(y >= 0.0, y, 0.01 * y).astype(o_ref.dtype)   # LeakyReLU(0.01)


def conv3x3_s2_lrelu(x, wf_bf16, b_col):
    """Conv2d(C,C,3,stride=2,pad=1)+LeakyReLU. x NCHW, wf (Cout,C*9) bf16, b (Cout,1) f32."""
    B, C, H, W = x.shape
    Cout = wf_bf16.shape[0]
    Ho, Wo = (H + 1) // 2, (W + 1) // 2
    # im2col glue stays in XLA, but in bf16 (halves HBM traffic of the patch tensor).
    # TODO(synk): in-kernel strided tap extraction (pl.ds stride-2 loads from a pl.ANY HBM
    # block) would remove the 9x read amplification of the im2col gather entirely.
    xp = jnp.pad(x.astype(jnp.bfloat16), ((0, 0), (0, 0), (1, 1), (1, 1)))
    taps = [xp[:, :, kh:kh + 2 * Ho:2, kw:kw + 2 * Wo:2]          # (B,C,Ho,Wo) each
            for kh in range(3) for kw in range(3)]
    patches = jnp.stack(taps, axis=2)                             # (B, C, 9, Ho, Wo)
    patches = patches.transpose(1, 2, 0, 3, 4).reshape(C * 9, B * Ho * Wo)

    T = B * Ho * Wo
    tb = _pick_block(T)

    y = pl.pallas_call(
        _conv_mm_kernel,
        out_shape=jax.ShapeDtypeStruct((Cout, T), jnp.bfloat16),   # bf16 interchange
        grid=(T // tb,),
        in_specs=[
            pl.BlockSpec((C * 9, tb), lambda i: (0, i)),
            pl.BlockSpec((Cout, C * 9), lambda i: (0, 0)),
            pl.BlockSpec((Cout, 1), lambda i: (0, 0)),
        ],
        out_specs=pl.BlockSpec((Cout, tb), lambda i: (0, i)),
        compiler_params=pltpu.CompilerParams(dimension_semantics=("parallel",)),
    )(patches, wf_bf16, b_col)
    return y.reshape(Cout, B, Ho, Wo).transpose(1, 0, 2, 3)       # back to NCHW (bf16)


# ----------------------------------------------------------------------------
# Kernel 2: PE add + ALL TransformerEncoderLayers fused, tokens in lanes (S, E, N)
# ----------------------------------------------------------------------------

def _fused_encoder_kernel(x_ref, pe_ref, wqkv_ref, bqkv_ref, wo_ref, bo_ref,
                          ln1g_ref, ln1b_ref, w1_ref, b1_ref,
                          w2_ref, b2_ref, ln2g_ref, ln2b_ref,
                          o_ref, *, nlayers, nhead, eps):
    S, E, NB = x_ref.shape              # S = seq axis (= image batch), tokens in lanes
    dh = E // nhead
    scale = 1.0 / math.sqrt(dh)

    # Layer-0 input: bf16 activation upcast + positional encoding (broadcast over lanes).
    cur = [x_ref[s].astype(jnp.float32) + pe_ref[s] for s in range(S)]     # (E, NB) f32

    for l in range(nlayers):            # static unroll over the 2 encoder layers
        wqkv = wqkv_ref[l]              # (3E, E)  bf16 (torch in_proj_weight layout)
        wo = wo_ref[l]                  # (E, E)   bf16 (torch out_proj.weight layout)
        w1 = w1_ref[l]                  # (dff, E) bf16
        w2 = w2_ref[l]                  # (E, dff) bf16
        dff = w1.shape[0]
        # Hoisted lane-broadcasts of biases / LN affine params (no per-iteration re-emit).
        bqkv = jnp.broadcast_to(bqkv_ref[l], (3 * E, NB))
        bo = jnp.broadcast_to(bo_ref[l], (E, NB))
        b1 = jnp.broadcast_to(b1_ref[l], (dff, NB))
        b2 = jnp.broadcast_to(b2_ref[l], (E, NB))
        g1 = jnp.broadcast_to(ln1g_ref[l], (E, NB))
        be1 = jnp.broadcast_to(ln1b_ref[l], (E, NB))
        g2 = jnp.broadcast_to(ln2g_ref[l], (E, NB))
        be2 = jnp.broadcast_to(ln2b_ref[l], (E, NB))

        # ---- QKV projection (S is tiny, unrolled); K/V kept bf16 to cut spill bytes ----
        qs, ks, vs = [], [], []
        for s in range(S):
            qkv = jnp.dot(wqkv, cur[s].astype(jnp.bfloat16),
                          preferred_element_type=jnp.float32) + bqkv        # (3E, NB) f32
            qs.append(qkv[:E])                                               # (E, NB) f32
            ks.append(qkv[E:2 * E].astype(jnp.bfloat16))                     # (E, NB) bf16
            vs.append(qkv[2 * E:].astype(jnp.bfloat16))                      # (E, NB) bf16

        nxt = []
        for i in range(S):
            # ---- attention row i: per-head softmax, tokens stay in lanes (VPU/XLU/EUP) --
            ctx_heads = []
            for h in range(nhead):
                q_h = qs[i][h * dh:(h + 1) * dh]                             # (dh, NB) f32
                s_ij = [jnp.sum(q_h * ks[j][h * dh:(h + 1) * dh].astype(jnp.float32),
                                axis=0, keepdims=True) * scale               # (1, NB)
                        for j in range(S)]
                m = s_ij[0]
                for j in range(1, S):
                    m = jnp.maximum(m, s_ij[j])
                p_ij = [jnp.exp(s_ij[j] - m) for j in range(S)]
                denom = p_ij[0]
                for j in range(1, S):
                    denom = denom + p_ij[j]
                inv = pl.reciprocal(denom, approx=True)                      # EUP slot
                acc = p_ij[0] * vs[0][h * dh:(h + 1) * dh].astype(jnp.float32)
                for j in range(1, S):
                    acc = acc + p_ij[j] * vs[j][h * dh:(h + 1) * dh].astype(jnp.float32)
                ctx_heads.append(acc * inv)                                  # (dh, NB) f32
            # Heads concatenated along sublanes (8-aligned slabs) -> single K=E out-proj.
            ctx = jnp.concatenate(ctx_heads, axis=0)                         # (E, NB)

            attn = jnp.dot(wo, ctx.astype(jnp.bfloat16),
                           preferred_element_type=jnp.float32) + bo          # (E, NB)
            z = cur[i] + attn
            mean = jnp.mean(z, axis=0, keepdims=True)                        # lane-dense LN
            zc = z - mean
            var = jnp.mean(zc * zc, axis=0, keepdims=True)                   # biased (torch)
            x1 = zc * jax.lax.rsqrt(var + eps) * g1 + be1

            hmid = jnp.dot(w1, x1.astype(jnp.bfloat16),
                           preferred_element_type=jnp.float32) + b1          # (dff, NB)
            hmid = jnp.maximum(hmid, 0.0)                                    # relu
            ff = jnp.dot(w2, hmid.astype(jnp.bfloat16),
                         preferred_element_type=jnp.float32) + b2            # (E, NB)
            z2 = x1 + ff
            mean2 = jnp.mean(z2, axis=0, keepdims=True)
            zc2 = z2 - mean2
            var2 = jnp.mean(zc2 * zc2, axis=0, keepdims=True)
            nxt.append(zc2 * jax.lax.rsqrt(var2 + eps) * g2 + be2)
        cur = nxt

    for s in range(S):
        o_ref[s] = cur[s].astype(o_ref.dtype)


def fused_encoder_layers(x_t, pe_t, enc):
    """x_t: (S, E, N) bf16 tokens-in-lanes; pe_t: (S, E, 1) f32. Returns (S, E, N) bf16."""
    S, E, N = x_t.shape
    L = enc["wqkv"].shape[0]
    nb = _pick_block(N)

    x_spec = pl.BlockSpec((S, E, nb), lambda i: (0, 0, i))
    consts = [enc["wqkv"], enc["bqkv"], enc["wo"], enc["bo"],
              enc["ln1_g"], enc["ln1_b"], enc["w1"], enc["b1"],
              enc["w2"], enc["b2"], enc["ln2_g"], enc["ln2_b"]]
    return pl.pallas_call(
        partial(_fused_encoder_kernel, nlayers=L, nhead=enc["nhead"], eps=1e-5),
        out_shape=jax.ShapeDtypeStruct((S, E, N), jnp.bfloat16),
        grid=(N // nb,),
        in_specs=[x_spec, _const_spec(pe_t)] + [_const_spec(a) for a in consts],
        out_specs=x_spec,
        compiler_params=pltpu.CompilerParams(dimension_semantics=("parallel",)),
    )(x_t, pe_t, *consts)


# ----------------------------------------------------------------------------
# Module forward (JAX glue around the Pallas kernels)
# ----------------------------------------------------------------------------

def positional_encoding_table(max_len, d_model):
    position = jnp.arange(max_len, dtype=jnp.float32)[:, None]
    div_term = jnp.exp(jnp.arange(0, d_model, 2, dtype=jnp.float32)
                       * (-math.log(10000.0) / d_model))
    pe = jnp.zeros((max_len, 1, d_model), dtype=jnp.float32)
    pe = pe.at[:, 0, 0::2].set(jnp.sin(position * div_term))
    pe = pe.at[:, 0, 1::2].set(jnp.cos(position * div_term))
    return pe


def transformer_block_forward(x, params):
    out_c = params["out_c"]
    for (wf, b) in params["convs"]:
        x = conv3x3_s2_lrelu(x, wf, b)                  # NCHW -> NCHW (bf16 interchange)
    B = x.shape[0]
    x = x.reshape(B, -1, out_c)                         # row-major == torch .view(B,-1,out_c)
    x_t = jnp.transpose(x, (0, 2, 1)).astype(jnp.bfloat16)   # (S, E, N): tokens in lanes
    pe_t = jnp.transpose(params["pe"][:B], (0, 2, 1))         # (S, E, 1) f32 (added in-kernel)
    y_t = fused_encoder_layers(x_t, pe_t, params["enc"])
    # transformer_encoder(x)[:, 0, :]: final LayerNorm is per-position -> only column 0
    # survives; normalize it in plain jnp (a Pallas call here would be pure launch overhead).
    x0 = y_t[:, :, 0].astype(jnp.float32)               # (S, E) = (B, out_c)
    mean = jnp.mean(x0, axis=-1, keepdims=True)
    xc = x0 - mean
    var = jnp.mean(xc * xc, axis=-1, keepdims=True)
    return xc * jax.lax.rsqrt(var + 1e-5) * params["final_g"] + params["final_b"]


# ----------------------------------------------------------------------------
# Deterministic parameter initialization (synthetic; shapes follow __init__)
# ----------------------------------------------------------------------------

def init_params(key, out_c, spatial, num_encoder_layers, nhead, dim_ff, max_len=5000):
    num_pools = int(math.log2(spatial)) - 4
    num_convs = max(num_pools - 1, 0)
    n_keys = max(1, 2 * num_convs + 8 * num_encoder_layers)
    keys = iter(jax.random.split(key, n_keys))

    def rnd(shape, scale=0.05):
        return (scale * jax.random.normal(next(keys), shape)).astype(jnp.float32)

    convs = []
    for _ in range(num_convs):
        w = rnd((out_c, out_c, 3, 3))
        b = rnd((out_c,))
        convs.append((w.reshape(out_c, out_c * 9).astype(jnp.bfloat16),
                      b.reshape(out_c, 1)))

    L = num_encoder_layers
    wqkv, bqkv, wo, bo, w1, b1, w2, b2 = ([] for _ in range(8))
    for _ in range(L):
        wqkv.append(rnd((3 * out_c, out_c)))     # torch in_proj_weight layout (3E, E)
        bqkv.append(rnd((3 * out_c, 1)))
        wo.append(rnd((out_c, out_c)))           # torch out_proj.weight layout (E, E)
        bo.append(rnd((out_c, 1)))
        w1.append(rnd((dim_ff, out_c)))
        b1.append(rnd((dim_ff, 1)))
        w2.append(rnd((out_c, dim_ff)))
        b2.append(rnd((out_c, 1)))

    enc = dict(
        nhead=nhead,
        wqkv=jnp.stack(wqkv).astype(jnp.bfloat16),
        bqkv=jnp.stack(bqkv),
        wo=jnp.stack(wo).astype(jnp.bfloat16),
        bo=jnp.stack(bo),
        ln1_g=jnp.ones((L, out_c, 1), jnp.float32),
        ln1_b=jnp.zeros((L, out_c, 1), jnp.float32),
        w1=jnp.stack(w1).astype(jnp.bfloat16),
        b1=jnp.stack(b1),
        w2=jnp.stack(w2).astype(jnp.bfloat16),
        b2=jnp.stack(b2),
        ln2_g=jnp.ones((L, out_c, 1), jnp.float32),
        ln2_b=jnp.zeros((L, out_c, 1), jnp.float32),
    )

    return dict(
        out_c=out_c,
        convs=convs,
        enc=enc,
        pe=positional_encoding_table(max_len, out_c),
        final_g=jnp.ones((out_c,), jnp.float32),
        final_b=jnp.zeros((out_c,), jnp.float32),
    )


# ----------------------------------------------------------------------------

if __name__ == "__main__":
    B, out_c, spatial = 2, 32, 64          # num_pools = log2(64)-4 = 2 -> 1 conv+LeakyReLU
    num_encoder_layers = 2
    nhead, dim_ff = 4, 128                 # scaled-down nn.Transformer defaults

    key = jax.random.PRNGKey(0)
    kx, kp = jax.random.split(key)
    x = jax.random.normal(kx, (B, out_c, spatial, spatial), dtype=jnp.float32)
    params = init_params(kp, out_c, spatial, num_encoder_layers, nhead, dim_ff)

    out = transformer_block_forward(x, params)
    out = jax.block_until_ready(out)

    assert out.shape == (B, out_c), out.shape
    assert bool(jnp.all(jnp.isfinite(out)))
    print("KERNEL_OK")
</pallas_src>

<mosaic_0001>
module attributes {stable_mosaic.version = 11 : i64} {
  func.func @_conv_mm_kernel(%arg0: i32, %arg1: memref<288x512xbf16, #tpu.memory_space<vmem>>, %arg2: memref<32x288xbf16, #tpu.memory_space<vmem>>, %arg3: memref<32x1xf32, #tpu.memory_space<vmem>>, %arg4: memref<32x512xbf16, #tpu.memory_space<vmem>>) attributes {dimension_semantics = [#tpu.dimension_semantics<parallel>], iteration_bounds = array<i64: 4>, scalar_prefetch = 0 : i64, scratch_operands = 0 : i64, tpu.core_type = #tpu.core_type<tc>, window_params = [{transform_indices = @transform_0, window_bounds = array<i64: 288, 512>}, {pipeline_mode = #tpu.pipeline_mode<synchronous>, transform_indices = @transform_1, window_bounds = array<i64: 32, 288>}, {pipeline_mode = #tpu.pipeline_mode<synchronous>, transform_indices = @transform_2, window_bounds = array<i64: 32, 1>}, {transform_indices = @transform_3, window_bounds = array<i64: 32, 512>}]} {
    %c0 = arith.constant 0 : index
    %c0_0 = arith.constant 0 : index
    %0 = vector.load %arg2[%c0, %c0_0] : memref<32x288xbf16, #tpu.memory_space<vmem>>, vector<32x288xbf16>
    %c0_1 = arith.constant 0 : index
    %c0_2 = arith.constant 0 : index
    %1 = vector.load %arg1[%c0_1, %c0_2] : memref<288x512xbf16, #tpu.memory_space<vmem>>, vector<288x512xbf16>
    %cst = arith.constant dense<0.000000e+00> : vector<32x512xf32>
    %2 = tpu.matmul %0, %1, %cst {dimension_numbers = #tpu.dot_dimension_numbers<[1], [0], [0], [1], [0, 0, 1, 1], [], []>} : vector<32x288xbf16>, vector<288x512xbf16>, vector<32x512xf32> -> vector<32x512xf32>
    %c0_3 = arith.constant 0 : index
    %c0_4 = arith.constant 0 : index
    %3 = vector.load %arg3[%c0_3, %c0_4] : memref<32x1xf32, #tpu.memory_space<vmem>>, vector<32x1xf32>
    %4 = vector.broadcast %3 : vector<32x1xf32> to vector<32x512xf32>
    %5 = arith.addf %2, %4 : vector<32x512xf32>
    %cst_5 = arith.constant 0.000000e+00 : f32
    %6 = vector.broadcast %cst_5 : f32 to vector<32x512xf32>
    %7 = arith.cmpf oge, %5, %6 : vector<32x512xf32>
    %cst_6 = arith.constant 0.00999999977 : f32
    %8 = vector.broadcast %cst_6 : f32 to vector<32x512xf32>
    %9 = arith.mulf %8, %5 : vector<32x512xf32>
    %10 = arith.select %7, %5, %9 : vector<32x512xi1>, vector<32x512xf32>
    %11 = arith.truncf %10 : vector<32x512xf32> to vector<32x512xbf16>
    %c0_7 = arith.constant 0 : index
    %c0_8 = arith.constant 0 : index
    %12 = vector.load %arg4[%c0_7, %c0_8] : memref<32x512xbf16, #tpu.memory_space<vmem>>, vector<32x512xbf16>
    tpu.vector_store %arg4[%c0_7, %c0_8], %11 {strides = array<i32>} : memref<32x512xbf16, #tpu.memory_space<vmem>>, vector<32x512xbf16>,
    return
  }
  func.func @transform_0(%arg0: i32) -> (i32, i32) {
    %c0_i32 = arith.constant 0 : i32
    %c0_i32_0 = arith.constant 0 : i32
    return %c0_i32, %arg0 : i32, i32
  }
  func.func @transform_1(%arg0: i32) -> (i32, i32) {
    %c0_i32 = arith.constant 0 : i32
    %c0_i32_0 = arith.constant 0 : i32
    %c0_i32_1 = arith.constant 0 : i32
    return %c0_i32, %c0_i32_0 : i32, i32
  }
  func.func @transform_2(%arg0: i32) -> (i32, i32) {
    %c0_i32 = arith.constant 0 : i32
    %c0_i32_0 = arith.constant 0 : i32
    %c0_i32_1 = arith.constant 0 : i32
    return %c0_i32, %c0_i32_0 : i32, i32
  }
  func.func @transform_3(%arg0: i32) -> (i32, i32) {
    %c0_i32 = arith.constant 0 : i32
    %c0_i32_0 = arith.constant 0 : i32
    return %c0_i32, %arg0 : i32, i32
  }
}

</mosaic_0001>

<bundles_post_ra>
// kernel: tpu_custom_call.1
= control target key start
LH: loop header
LB: loop body
LE: loop exit
PB: predicated region body
PF: predicated region fallthrough
CT: control target
= control target key end

     0   :  { %8 = vsyncpa [#allocation3], 0  ;;  %s1892_s0 = inlined_call_operand.hbm [shape: bf16[288,2048], index: 0, kind: input, shape index: {}]   ;;  %s1893_s1 = inlined_call_operand.hbm [shape: bf16[32,288], index: 1, kind: input, shape index: {}]   ;;  %s1894_s2 = inlined_call_operand.vmem [shape: f32[32,1], index: 2, kind: input, shape index: {}]   ;;  %s1895_s3 = inlined_call_operand.hbm [shape: bf16[32,2048], index: 3, kind: output, shape index: {}]  }
   0x1   :  { %10 = vsyncpa [#allocation3 + $0x1], 0 }
   0x2   :  { %11 = vsyncpa [#allocation6], 0 }
   0x3   :  { %12 = vsyncpa [#allocation4], 0 }
   0x4   :  { %14 = vsyncpa [#allocation4 + $0x1], 0  ;;  %s1577_s12 = smov 0   ;;  %s1579_s13 = smov 0  }
   0x5   :  { %s1581_s14 = smov 0   ;;  %s1583_s15 = smov 0  }
   0x6 LB: > { %s1598_s16 = sadd.s32 4294967295, %s1543_s15   ;;  %s1121_s17 = sadd.s32 4294967294, %s1543_s15   ;;  %s1543_s15 = sphi %s1583_s15, %s1916_s15   ;;  %s1539_s14 = sphi %s1581_s14, %s1915_s14   ;;  %s1535_s13 = sphi %s1579_s13, %s1914_s13   ;;  %s1531_s12 = sphi %s1577_s12, %s1913_s12  }
   0x7   : > { %s1602_s18 = sadd.s32 1, %s1543_s15   ;;  %s27_s19 = sadd.s32 1, %s1539_s14 }
   0x8   : > { %s24_s20 = ssub.s32 %s1543_s15, %s1602_s18  ;;  %p34_p0 = scmp.ne.s32.totalorder %s1539_s14, %s1535_s13 }
   0x9   : > { %p25_p1 = scmp.eq.s32.totalorder %s24_s20, 0  ;;  %p35_p2 = scmp.eq.s32.totalorder %s1543_s15, 0 }
   0xa   : > { %p40_p3 = scmp.ne.s32.totalorder %s1535_s13, %s1531_s12  ;;  %p1898_p4 = scmp.eq.s32.totalorder %s1598_s16, 0 }
   0xb   : > { %s1614_s21 = scalar_select %p25_p1, %s1539_s14, %s27_s19  }
   0xc   : > { %p1616_p5 = por %p35_p2, %p34_p0  ;;  %p1622_p6 = por %p1898_p4, %p40_p3 }
   0xd   : > { %p106_p7 = scmp.eq.s32.totalorder %s1598_s16, 3  ;;  %p112_p8 = scmp.eq.s32.totalorder %s1121_s17, 3 }
   0xe   : > { %s1901_s23 = scalar_select %p1622_p6, 1, 0 }
   0xf   : > { %p1122_p9 = scmp.ge.s32.totalorder %s1543_s15, 1  ;;  %p119_p10 = scmp.lt.s32.totalorder %s1543_s15, 5 }
  0x10   : > { %p1629_p11 = por %p106_p7, %p34_p0  ;;  %p1633_p12 = por %p112_p8, %p40_p3 }
  0x11   : > { %p1637_p13 = pnand %p1122_p9, %p119_p10  ;;  %s1545_s27 = smov [#allocation5]  }
  0x12   : > { %s1902_s24 = scalar_select %p1629_p11, 1, 0 }
  0x13   : > { %s1903_s25 = scalar_select %p1633_p12, 1, 0 }
  0x14   : > { %s1904_s26 = scalar_select %p1637_p13, 1, 0 }
  0x15   : > { %p1245_p1 = pneg %p1637_p13  ;;  %s131_s28 = sshll.u32 %s1545_s27, 4  ;;  %s132_s28 = int_to_ptr.vmem [resolvable:$true] %s131_s28 }
  0x16   : > { %p1258_p0 = scmp.lt.s32.totalorder %s1543_s15, 4  ;;  %s148_s30 = sand.u32 1, %s1539_s14  }
  0x17   : > { %p1645_p2 = pnand %p1245_p1, %p1898_p4  ;;  %s1432_s4 = scalar_lea.vmem %s132_s28, 768 }
  0x18   : > { %p1433_p7 = scmp.ne.s32.totalorder %s132_s28, %s1432_s4  ;;  %p1440_p10 = scmp.lt.s32.totalorder %s132_s28, %s132_s28 }
  0x19   : > { %p1423_p3 = pneg %p1645_p2  ;;  %p1441_p12 = scmp.lt.s32.totalorder %s1432_s4, %s1432_s4 }
  0x1b   : > { %p1435_p8 = pnand %p1433_p7, %p1423_p3  ;;  %p1442_p11 = por %p1441_p12, %p1440_p10 }
  0x1d   : > { %p1436_p9 = pneg %p1435_p8 }
  0x1f   : > { %p1443_p6 = pnand %p1442_p11, %p1436_p9 }
  0x21   : > { %1446 = shalt.err (!%p1443_p6)
}
  0x22   : > { %s1546_s5 = smov 192   ;;  %s1547_s6 = smov 12  }
  0x23   : > { %1248 = dma.hbm_to_vmem [thread:$0]  (!%p1645_p2), %s1893_s1, 768, %s132_s28, [#allocation6], %s1546_s5, %s1546_s5, %s1547_s6  }
  0x24   : > { %p1662_p1 = pnand %p1258_p0, %p1616_p5  ;;  %s1235_s10 = smul.u32 576, %s148_s30 }
  0x25   : > { %s1225_s11 = sshll.u32 %s1543_s15, 8  ;;  %s1674_s22 = scalar_lea.sflag [#allocation3], %s148_s30 }
  0x26   : > { %s1670_s20 = scalar_lea.hbm %s1892_s0, %s1225_s11  ;;  %s152_s27 = scalar_lea.vmem [#allocation2], %s1235_s10 }
  0x27   : > { %s159_s29 = sshll.u32 %s152_s27, 4  ;;  %s1447_s28 = scalar_lea.hbm %s1670_s20, 9216  ;;  %s1672_s29 = int_to_ptr.vmem [resolvable:$true] %s159_s29 }
  0x28   : > { %p1448_p5 = scmp.ne.s32.totalorder %s1670_s20, %s1447_s28  ;;  %p1449_p6 = pneg %p1662_p1 }
  0x29   : > { %s1452_s6 = scalar_lea.hbm %s1892_s0, 36864  ;;  %p1453_p2 = scmp.lt.s32.totalorder %s1670_s20, %s1892_s0 }
  0x2a   : > { %p1450_p11 = pnand %p1449_p6, %p1448_p5  ;;  %p1454_p0 = scmp.lt.s32.totalorder %s1452_s6, %s1447_s28 }
  0x2c   : > { %p1451_p12 = pneg %p1450_p11  ;;  %p1455_p3 = por %p1454_p0, %p1453_p2 }
  0x2e   : > { %p1456_p7 = pnand %p1455_p3, %p1451_p12 }
  0x30   : > { %1459 = shalt.err (!%p1456_p7)
}
  0x31   : > { %s1460_s30 = scalar_lea.vmem %s1672_s29, 9216  ;;  %s1548_s10 = smov [#allocation2]  }
  0x32   : > { %p1461_p8 = scmp.ne.s32.totalorder %s1672_s29, %s1460_s30  ;;  %s1465_s11 = sshll.u32 %s1548_s10, 4  ;;  %s1466_s11 = int_to_ptr.vmem [resolvable:$false] %s1465_s11 }
  0x33   : > { %s1467_s17 = scalar_lea.vmem %s1466_s11, 18432  ;;  %p1468_p5 = scmp.lt.s32.totalorder %s1672_s29, %s1466_s11 }
  0x34   : > { %p1463_p9 = pnand %p1461_p8, %p1449_p6  ;;  %p1469_p11 = scmp.lt.s32.totalorder %s1467_s17, %s1460_s30 }
  0x36   : > { %p1464_p10 = pneg %p1463_p9  ;;  %p1470_p4 = por %p1469_p11, %p1468_p5 }
  0x38   : > { %p1471_p13 = pnand %p1470_p4, %p1464_p10 }
  0x3a   : > { %1474 = shalt.err (!%p1471_p13)
}
  0x3b   : > { %s1549_s19 = smov 1024   ;;  %s1550_s27 = smov 256  }
  0x3c   : > { %s1551_s28 = smov 16   ;;  %p1907_p6 = scmp.ne.s32.totalorder %s1904_s26, 0 }
  0x3d   : > { %1252 = dma.hbm_to_vmem [thread:$0]  (!%p1662_p1), %s1670_s20, 9216, %s1672_s29, %s1674_s22, %s1549_s19, %s1550_s27, %s1551_s28  }
  0x3e   : > { %171 = sbr.rel (%p1907_p6) target bundleno = 382 (0x17e), region = 32  ;;  %s1698_s4 = sand.u32 (!%p1907_p6), 1, %s1535_s13  }
  0x3f   : > { %s1236_s5 = smul.u32 (!%p1907_p6), 576, %s1698_s4  ;;  %s174_s6 = scalar_lea.sflag (!%p1907_p6), [#allocation3], %s1698_s4 }
  0x40   : > { %p1908_p4 = scmp.ne.s32.totalorder (!%p1907_p6), %s1901_s23, 0 }
  0x41   : > { %s1702_s7 = scalar_lea.vmem (!%p1907_p6), [#allocation2], %s1236_s5 }
  0x43   : > { %1518 = dma.done.wait (%p1908_p4), %s174_s6, 9216  }
  0x44   : > { %1520 = vsyncadd (%p1908_p4), %s174_s6, 4294958080  ;;  %p1909_p13 = scmp.eq.s32.totalorder %s1598_s16, 0 }
  0x46   : > { %1522 = dma.done.wait (%p1909_p13), [#allocation6], 768   ;;  %p1910_p1 = pmov %p1909_p13 }
  0x47   : > { %v1552_v0 = vmov 0   ;;  %v1305_v1 = vld [vmem:[%s1702_s7 + $0xe4] ss:$16 sps:$4 sm:$0xff]   ;;  %v1307_v2 = vld [vmem:[%s1702_s7 + $0xe0] ss:$16 sps:$4 sm:$0xff]   ;;  %vm701_vm0 = vcmask 261120  }
  0x48   : > { %1524 = vsyncadd (%p1910_p1), [#allocation6], 4294966528  ;;  %793 = vmatprep.mubr.bf16.mxu1 %v1552_v0  ;;  %1303 = vset.pattern.permute.xlu0 %v1552_v0  ;;  %v1308_v3 = vld [vmem:[%s1702_s7 + $0x224] ss:$16 sps:$4 sm:$0xff]   ;;  %v1310_v4 = vld [vmem:[%s1702_s7 + $0x220] ss:$16 sps:$4 sm:$0xff]  }
  0x49   : > { %1304 = vset.pattern.permute.xlu1 %v1552_v0  ;;  %708 = vmatprep.subr.bf16.mxu0 %v1305_v1  ;;  %v1311_v5 = vld [vmem:[%s1702_s7 + $0xc4] ss:$16 sps:$4 sm:$0xff]   ;;  %v1313_v6 = vld [vmem:[%s1702_s7 + $0xc0] ss:$16 sps:$4 sm:$0xff]   ;;  %v1320_v11 = vld [vmem:[%s1702_s7 + $0xe8] ss:$16 sps:$4 sm:$0xff]  }
  0x4a   : > { %709 = vmatpush1.bf16.msra.mxu0 %v1307_v2  ;;  %773 = vmatprep.subr.bf16.mxu1 %v1308_v3  ;;  %v1314_v7 = vld [vmem:[%s1702_s7 + $0x204] ss:$16 sps:$4 sm:$0xff]   ;;  %v1316_v8 = vld [vmem:[%s1702_s7 + $0x200] ss:$16 sps:$4 sm:$0xff]   ;;  %v1322_v12 = vld [vmem:[%s1702_s7 + $0xec] ss:$16 sps:$4 sm:$0xff]  }
  0x4b   : > { %774 = vmatpush1.bf16.msra.mxu1 %v1310_v4  ;;  %710 = vmatprep.subr.bf16.mxu0 %v1311_v5  ;;  %v1317_v9 = vld [vmem:[%s1702_s7 + $0xa4] ss:$16 sps:$4 sm:$0xff]   ;;  %v1319_v10 = vld [vmem:[%s1702_s7 + $0xa0] ss:$16 sps:$4 sm:$0xff]   ;;  %v1329_v16 = vld [vmem:[%s1702_s7 + $0xcc] ss:$16 sps:$4 sm:$0xff]  }
  0x4c   : > { %775 = vmatprep.subr.bf16.mxu1 %v1314_v7  ;;  %v1727_v13 = vld [vmem:[#allocation5 + $0x8] ss:$12 sps:$4 sm:$0xff]   ;;  %v1326_v15 = vld [vmem:[%s1702_s7 + $0x80] ss:$16 sps:$4 sm:$0xff]   ;;  %v1335_v19 = vld [vmem:[%s1702_s7 + $0xac] ss:$16 sps:$4 sm:$0xff]  }
  0x4d   : > { %v1324_v14 = vld [vmem:[%s1702_s7 + $0x84] ss:$16 sps:$4 sm:$0xff]   ;;  %v1327_v18 = vld [vmem:[%s1702_s7 + $0xc8] ss:$16 sps:$4 sm:$0xff]   ;;  %v1332_v20 = vld [vmem:[%s1702_s7 + $0x60] ss:$16 sps:$4 sm:$0xff]  }
  0x4e   : > { %711 = vmatpush1.bf16.msra.mxu0 %v1313_v6  ;;  %v1330_v17 = vld [vmem:[%s1702_s7 + $0x64] ss:$16 sps:$4 sm:$0xff]   ;;  %v1333_v22 = vld [vmem:[%s1702_s7 + $0xa8] ss:$16 sps:$4 sm:$0xff]   ;;  %v1341_v23 = vld [vmem:[%s1702_s7 + $0x8c] ss:$16 sps:$4 sm:$0xff]  }
  0x4f   : > { %712 = vmatprep.subr.bf16.mxu0 %v1317_v9  ;;  %776 = vmatpush1.bf16.msra.mxu1 %v1316_v8  ;;  %v1336_v21 = vld [vmem:[%s1702_s7 + $0x44] ss:$16 sps:$4 sm:$0xff]   ;;  %v1338_v24 = vld [vmem:[%s1702_s7 + $0x40] ss:$16 sps:$4 sm:$0xff]   ;;  %v1339_v26 = vld [vmem:[%s1702_s7 + $0x88] ss:$16 sps:$4 sm:$0xff]  }
  0x50   : > { %814 = vmatprep.subr.bf16.mxu1 %v1322_v12  ;;  %v1342_v25 = vld [vmem:[%s1702_s7 + $0x24] ss:$16 sps:$4 sm:$0xff]   ;;  %v1347_v27 = vld [vmem:[%s1702_s7 + $0x6c] ss:$16 sps:$4 sm:$0xff]   ;;  %v1344_v28 = vld [vmem:[%s1702_s7 + $0x20] ss:$16 sps:$4 sm:$0xff]  }
  0x51   : > { %v1348_v29 = vld [vmem:[%s1702_s7 + $0x4] ss:$16 sps:$4 sm:$0xff]   ;;  %v1345_v30 = vld [vmem:[%s1702_s7 + $0x68] ss:$16 sps:$4 sm:$0xff]   ;;  %v1353_v31 = vld [vmem:[%s1702_s7 + $0x4c] ss:$16 sps:$4 sm:$0xff]  }
  0x52   : > { %713 = vmatpush1.bf16.msra.mxu0 %v1319_v10  ;;  %1208 = vmatmul.mubr.msk.bf16.vlgmr.msra.gmra.mxu1 %vm701_vm0, %v1727_v13  ;;  %v1350_v32 = vld [vmem:[%s1702_s7] ss:$16 sps:$4 sm:$0xff]   ;;  %v1354_v33 = vld [vmem:[%s1702_s7 + $0x1e4] ss:$16 sps:$4 sm:$0xff]   ;;  %v1351_v34 = vld [vmem:[%s1702_s7 + $0x48] ss:$16 sps:$4 sm:$0xff]  }
  0x53   : > { %714 = vmatprep.subr.bf16.mxu0 %v1324_v14  ;;  %815 = vmatpush1.bf16.msra.mxu1 %v1320_v11  ;;  %v1359_v35 = vld [vmem:[%s1702_s7 + $0x2c] ss:$16 sps:$4 sm:$0xff]   ;;  %v1356_v36 = vld [vmem:[%s1702_s7 + $0x1e0] ss:$16 sps:$4 sm:$0xff]   ;;  %v1360_v37 = vld [vmem:[%s1702_s7 + $0x1c4] ss:$16 sps:$4 sm:$0xff]  }
  0x54   : > { %803 = vmatprep.mubr.bf16.mxu1 %v1552_v0  ;;  %816 = vmatprep.subr.bf16.mxu1 %v1329_v16  ;;  %v1357_v38 = vld [vmem:[%s1702_s7 + $0x28] ss:$16 sps:$4 sm:$0xff]   ;;  %v1365_v39 = vld [vmem:[%s1702_s7 + $0xc] ss:$16 sps:$4 sm:$0xff]   ;;  %v1362_v40 = vld [vmem:[%s1702_s7 + $0x1c0] ss:$16 sps:$4 sm:$0xff]  }
  0x55   : > { %v1366_v41 = vld [vmem:[%s1702_s7 + $0x1a4] ss:$16 sps:$4 sm:$0xff]   ;;  %v1363_v42 = vld [vmem:[%s1702_s7 + $0x8] ss:$16 sps:$4 sm:$0xff]   ;;  %v1371_v43 = vld [vmem:[%s1702_s7 + $0x1ec] ss:$16 sps:$4 sm:$0xff]  }
  0x56   : > { %715 = vmatpush1.bf16.msra.mxu0 %v1326_v15  ;;  %v1368_v44 = vld [vmem:[%s1702_s7 + $0x1a0] ss:$16 sps:$4 sm:$0xff]   ;;  %v1372_v45 = vld [vmem:[%s1702_s7 + $0x184] ss:$16 sps:$4 sm:$0xff]   ;;  %v1369_v46 = vld [vmem:[%s1702_s7 + $0x1e8] ss:$16 sps:$4 sm:$0xff]  }
  0x57   : > { %716 = vmatprep.subr.bf16.mxu0 %v1330_v17  ;;  %817 = vmatpush1.bf16.msra.mxu1 %v1327_v18  ;;  %v1377_v47 = vld [vmem:[%s1702_s7 + $0x1cc] ss:$16 sps:$4 sm:$0xff]   ;;  %v1374_v48 = vld [vmem:[%s1702_s7 + $0x180] ss:$16 sps:$4 sm:$0xff]   ;;  %v1375_v49 = vld [vmem:[%s1702_s7 + $0x1c8] ss:$16 sps:$4 sm:$0xff]  }
  0x58   : > { %818 = vmatprep.subr.bf16.mxu1 %v1335_v19  ;;  %v1378_v50 = vld [vmem:[%s1702_s7 + $0x164] ss:$16 sps:$4 sm:$0xff]   ;;  %v1380_v52 = vld [vmem:[%s1702_s7 + $0x160] ss:$16 sps:$4 sm:$0xff]   ;;  %v1383_v53 = vld [vmem:[%s1702_s7 + $0x1ac] ss:$16 sps:$4 sm:$0xff]  }
  0x59   : > { %v1404_v51 = vld [vmem:[#allocation5 + $0x4] ss:$12 sps:$4 sm:$0xff]   ;;  %v1771_v54 = vld [vmem:[#allocation5 + $0x20] ss:$12 sps:$4 sm:$0xff]   ;;  %v1381_v56 = vld [vmem:[%s1702_s7 + $0x1a8] ss:$16 sps:$4 sm:$0xff]  }
  0x5a   : > { %717 = vmatpush1.bf16.msra.mxu0 %v1332_v20  ;;  %740 = vmatprep.mubr.bf16.mxu0 %v1404_v51  ;;  %v1384_v55 = vld [vmem:[%s1702_s7 + $0x144] ss:$16 sps:$4 sm:$0xff]   ;;  %v1389_v57 = vld [vmem:[%s1702_s7 + $0x18c] ss:$16 sps:$4 sm:$0xff]   ;;  %v1386_v58 = vld [vmem:[%s1702_s7 + $0x140] ss:$16 sps:$4 sm:$0xff]  }
  0x5b   : > { %718 = vmatprep.subr.bf16.mxu0 %v1336_v21  ;;  %819 = vmatpush1.bf16.msra.mxu1 %v1333_v22  ;;  %v1390_v59 = vld [vmem:[%s1702_s7 + $0x124] ss:$16 sps:$4 sm:$0xff]   ;;  %v1387_v61 = vld [vmem:[%s1702_s7 + $0x188] ss:$16 sps:$4 sm:$0xff]   ;;  %v1395_v63 = vld [vmem:[%s1702_s7 + $0x16c] ss:$16 sps:$4 sm:$0xff]  }
  0x5c   : > { %820 = vmatprep.subr.bf16.mxu1 %v1341_v23  ;;  %1209 = vmatmul.mubr.msk.bf16.gmra.mxu1 %vm701_vm0, %v1771_v54  ;;  %v287_v60 = vld [vmem:[%s1894_s2] sm:$0xff]  ;;  %v289_v62 = vld [vmem:[%s1894_s2 + $0x10] sm:$0xff]  ;;  %v288_v1 = vld [vmem:[%s1894_s2 + $0x8] sm:$0xff]  ;;  %s1129_s10 = sshll.u32 %s1698_s4, 6  ;;  %s1234_s19 = sshll.u32 %s1598_s16, 8 }
  0x5d   : > { %846 = vmatprep.mubr.bf16.mxu1 %v1404_v51  ;;  %293 = vperm.xlu0 %1303, %v287_v60   ;;  %v1392_v2 = vld [vmem:[%s1702_s7 + $0x120] ss:$16 sps:$4 sm:$0xff]   ;;  %v290_v3 = vld [vmem:[%s1894_s2 + $0x18] sm:$0xff]  ;;  %v1396_v4 = vld [vmem:[%s1702_s7 + $0x104] ss:$16 sps:$4 sm:$0xff]   ;;  %s1825_s11 = scalar_lea.vmem [#allocation7], %s1129_s10  ;;  %s1849_s5 = scalar_lea.hbm %s1895_s3, %s1234_s19 }
  0x5e   : > { %719 = vmatpush1.bf16.msra.mxu0 %v1338_v24  ;;  %303 = vperm.xlu1 %1304, %v289_v62   ;;  %v1393_v5 = vld [vmem:[%s1702_s7 + $0x168] ss:$16 sps:$4 sm:$0xff]   ;;  %v1401_v6 = vld [vmem:[%s1702_s7 + $0x14c] ss:$16 sps:$4 sm:$0xff]   ;;  %v1398_v7 = vld [vmem:[%s1702_s7 + $0x100] ss:$16 sps:$4 sm:$0xff]  }
  0x5f   : > { %720 = vmatprep.subr.bf16.mxu0 %v1342_v25  ;;  %821 = vmatpush1.bf16.msra.mxu1 %v1339_v26  ;;  %v1407_v8 = vld [vmem:[%s1702_s7 + $0x22c] ss:$16 sps:$4 sm:$0xff]   ;;  %v1399_v9 = vld [vmem:[%s1702_s7 + $0x148] ss:$16 sps:$4 sm:$0xff]   ;;  %s1038_s17 = sshll.u32 %s1825_s11, 4  ;;  %s1025_s6 = scalar_lea.sflag [#allocation4], %s1698_s4  ;;  %s1843_s17 = int_to_ptr.vmem [resolvable:$true] %s1038_s17 }
  0x60   : > { %822 = vmatprep.subr.bf16.mxu1 %v1347_v27  ;;  %v1402_v10 = vld [vmem:[#allocation5] ss:$12 sps:$4 sm:$0xff]   ;;  %v1405_v12 = vld [vmem:[%s1702_s7 + $0x228] ss:$16 sps:$4 sm:$0xff]   ;;  %p1911_p2 = scmp.ne.s32.totalorder %s1902_s24, 0  ;;  %s1553_s16 = smov [#allocation7]  }
  0x61   : > { %298 = vperm.xlu0 %1303, %v288_v1   ;;  %v1411_v11 = vld [vmem:[%s1702_s7 + $0x12c] ss:$16 sps:$4 sm:$0xff]   ;;  %v1409_v16 = vld [vmem:[%s1702_s7 + $0x128] ss:$16 sps:$4 sm:$0xff]   ;;  %s1479_s23 = sshll.u32 %s1553_s16, 4  ;;  %s1480_s23 = int_to_ptr.vmem [resolvable:$false] %s1479_s23 }
  0x62   : > { %721 = vmatpush1.bf16.msra.mxu0 %v1344_v28  ;;  %308 = vperm.xlu1 %1304, %v290_v3   ;;  %v1415_v14 = vld [vmem:[#allocation5 + $0x1c] ss:$12 sps:$4 sm:$0xff]   ;;  %v1417_v20 = vld [vmem:[#allocation5 + $0x18] ss:$12 sps:$4 sm:$0xff]   ;;  %s1481_s26 = scalar_lea.vmem %s1480_s23, 2048  ;;  %p1482_p7 = scmp.lt.s32.totalorder %s1843_s17, %s1480_s23 }
  0x63   : > { %722 = vmatprep.subr.bf16.mxu0 %v1348_v29  ;;  %823 = vmatpush1.bf16.msra.mxu1 %v1345_v30  ;;  %v1420_v15 = vld [vmem:[%s1702_s7 + $0x20c] ss:$16 sps:$4 sm:$0xff]   ;;  %v1418_v18 = vld [vmem:[%s1702_s7 + $0x208] ss:$16 sps:$4 sm:$0xff]  }
  0x64   : > { %824 = vmatprep.subr.bf16.mxu1 %v1353_v31  ;;  %v1414_v17 = vld [vmem:[%s1702_s7 + $0x10c] ss:$16 sps:$4 sm:$0xff]   ;;  %v1412_v19 = vld [vmem:[%s1702_s7 + $0x108] ss:$16 sps:$4 sm:$0xff]   ;;  %s1475_s7 = scalar_lea.vmem %s1843_s17, 1024 }
  0x65   : > { %p1476_p12 = scmp.ne.s32.totalorder %s1843_s17, %s1475_s7  ;;  %p1483_p8 = scmp.lt.s32.totalorder %s1481_s26, %s1475_s7 }
  0x66   : > { %723 = vmatpush1.bf16.msra.mxu0 %v1350_v32 }
  0x67   : > { %724 = vmatprep.subr.bf16.mxu0 %v1354_v33  ;;  %825 = vmatpush1.bf16.msra.mxu1 %v1351_v34  ;;  %p1477_p0 = pnand %p1476_p12, %p1911_p2  ;;  %p1484_p9 = por %p1483_p8, %p1482_p7 }
  0x68   : > { %826 = vmatprep.subr.bf16.mxu1 %v1359_v35 }
  0x69   : > { %p1478_p3 = pneg %p1477_p0 }
  0x6a   : > { %725 = vmatpush2.bf16.msra.mxu0 %v1356_v36 }
  0x6b   : > { %726 = vmatprep.subr.bf16.mxu0 %v1360_v37  ;;  %827 = vmatpush1.bf16.msra.mxu1 %v1357_v38  ;;  %p1485_p10 = pnand %p1484_p9, %p1478_p3 }
  0x6c   : > { %828 = vmatprep.subr.bf16.mxu1 %v1365_v39 }
  0x6e   : > { %727 = vmatpush2.bf16.msra.mxu0 %v1362_v40 }
  0x6f   : > { %728 = vmatprep.subr.bf16.mxu0 %v1366_v41  ;;  %829 = vmatpush1.bf16.msra.mxu1 %v1363_v42 }
  0x70   : > { %830 = vmatprep.subr.bf16.mxu1 %v1371_v43 }
  0x72   : > { %729 = vmatpush2.bf16.msra.mxu0 %v1368_v44 }
  0x73   : > { %730 = vmatprep.subr.bf16.mxu0 %v1372_v45  ;;  %831 = vmatpush2.bf16.msra.mxu1 %v1369_v46 }
  0x74   : > { %832 = vmatprep.subr.bf16.mxu1 %v1377_v47 }
  0x76   : > { %731 = vmatpush2.bf16.msra.mxu0 %v1374_v48 }
  0x77   : > { %732 = vmatprep.subr.bf16.mxu0 %v1378_v50  ;;  %833 = vmatpush2.bf16.msra.mxu1 %v1375_v49 }
  0x78   : > { %834 = vmatprep.subr.bf16.mxu1 %v1383_v53 }
  0x7a   : > { %733 = vmatpush2.bf16.msra.mxu0 %v1380_v52 }
  0x7b   : > { %734 = vmatprep.subr.bf16.mxu0 %v1384_v55  ;;  %835 = vmatpush2.bf16.msra.mxu1 %v1381_v56 }
  0x7c   : > { %836 = vmatprep.subr.bf16.mxu1 %v1389_v57 }
  0x7e   : > { %735 = vmatpush2.bf16.msra.mxu0 %v1386_v58 }
  0x7f   : > { %736 = vmatprep.subr.bf16.mxu0 %v1390_v59  ;;  %837 = vmatpush2.bf16.msra.mxu1 %v1387_v61 }
  0x80   : > { %838 = vmatprep.subr.bf16.mxu1 %v1395_v63 }
  0x82   : > { %737 = vmatpush2.bf16.msra.mxu0 %v1392_v2 }
  0x83   : > { %738 = vmatprep.subr.bf16.mxu0 %v1396_v4  ;;  %839 = vmatpush2.bf16.msra.mxu1 %v1393_v5 }
  0x84   : > { %840 = vmatprep.subr.bf16.mxu1 %v1401_v6 }
  0x86   : > { %739 = vmatpush2.bf16.msra.mxu0 %v1398_v7 }
  0x87   : > { %879 = vmatprep.subr.bf16.mxu0 %v1407_v8  ;;  %841 = vmatpush2.bf16.msra.mxu1 %v1399_v9 }
  0x88   : > { %842 = vmatprep.subr.bf16.mxu1 %v1411_v11 }
  0x89   : > { %741 = vmatmul.mubr.bf16.vlgmr.msra.gmra.mxu0 %v1402_v10 }
  0x8a   : > { %880 = vmatpush1.bf16.msra.mxu0 %v1405_v12  ;;  %750 = vmatprep.mubr.bf16.mxu0 %v1415_v14 }
  0x8b   : > { %881 = vmatprep.subr.bf16.mxu0 %v1420_v15  ;;  %843 = vmatpush2.bf16.msra.mxu1 %v1409_v16 }
  0x8c   : > { %844 = vmatprep.subr.bf16.mxu1 %v1414_v17 }
  0x8e   : > { %882 = vmatpush1.bf16.msra.mxu0 %v1418_v18 }
  0x8f   : > { %845 = vmatpush2.bf16.msra.mxu1 %v1412_v19 }
  0x91   : > { %751 = vmatmul.mubr.bf16.gmra.mxu0 %v1417_v20 }
  0x92   : > { %899 = vmatprep.mubr.bf16.mxu0 %v1552_v0  ;;  %847 = vmatmul.mubr.bf16.vlgmr.msra.gmra.mxu1 %v1402_v10 }
  0x93   : > { %856 = vmatprep.mubr.bf16.mxu1 %v1415_v14 }
  0x99   : > { %1210 = vmatmul.mubr.msk.bf16.vlgmr.msra.gmra.mxu0 %vm701_vm0, %v1727_v13 }
  0x9a   : > { %909 = vmatprep.mubr.bf16.mxu0 %v1552_v0  ;;  %857 = vmatmul.mubr.bf16.gmra.mxu1 %v1417_v20 }
  0xa1   : > { %1211 = vmatmul.mubr.msk.bf16.gmra.mxu0 %vm701_vm0, %v1771_v54 }
  0xd8   : > { %v294_v26 = vpop.permute.xlu0 %293 }
  0xd9   : > { %v1817_v37 = vpop.permute.xlu1 %303 }
  0xdc   : > { %v1814_v30 = vpop.permute.xlu0 %298 }
  0xdd   : > { %v1823_v54 = vpop.permute.xlu1 %308 }
 0x112   : > { %v795_v21 = vpop.f32.mrf.mxu1 }
 0x114   : > { %v797_v22 = vpop.f32.mrf.mxu1 }
 0x116   : > { %v799_v23 = vpop.f32.mrf.mxu1 }
 0x118   : > { %v801_v24 = vpop.f32.mrf.mxu1 }
 0x11c   : > { %v805_v25 = vpop.f32.mrf.mxu1 }
 0x11e   : > { %v807_v27 = vpop.f32.mrf.mxu1 }
 0x120   : > { %v809_v13 = vpop.f32.mrf.mxu1 }
 0x122   : > { %v811_v39 = vpop.f32.mrf.mxu1 }
 0x149   : > { %v742_v28 = vpop.f32.mrf.mxu0 }
 0x14a   : > { %v743_v29 = vadd.f32 %v742_v28, %v294_v26 }
 0x14b   : > { %v744_v31 = vpop.f32.mrf.mxu0 }
 0x14c   : > { %v796_v32 = vadd.f32 %v795_v21, %v743_v29  ;;  %v745_v0 = vadd.f32 %v744_v31, %v294_v26 }
 0x14d   : > { %v746_v33 = vpop.f32.mrf.mxu0 }
 0x14e   : > { %v936_v34 = vmul.f32 0.01, %v796_v32  ;;  %v798_v35 = vadd.f32 %v797_v22, %v745_v0  ;;  %v747_v36 = vadd.f32 %v746_v33, %v1814_v30  ;;  %vm920_vm1 = vcmp.ge.f32.partialorder %v796_v32, 0.0 }
 0x14f   : > { %v748_v38 = vpop.f32.mrf.mxu0 }
 0x150   : > { %vm921_vm2 = vcmp.ge.f32.partialorder %v798_v35, 0.0  ;;  %v937_v40 = vmul.f32 0.01, %v798_v35  ;;  %v800_v41 = vadd.f32 %v799_v23, %v747_v36  ;;  %v749_v42 = vadd.f32 %v748_v38, %v1814_v30 }
 0x151   : > { %v752_v43 = vpop.f32.mrf.mxu0  ;;  %v952_v44 = vsel %vm920_vm1, %v796_v32, %v936_v34 }
 0x152   : > { %v953_v45 = vsel %vm921_vm2, %v798_v35, %v937_v40  ;;  %v753_v46 = vadd.f32 %v752_v43, %v1817_v37  ;;  %v940_v48 = vmul.f32 0.01, %v800_v41  ;;  %v802_v49 = vadd.f32 %v801_v24, %v749_v42  ;;  %v848_v50 = vpop.f32.mrf.mxu1 }
 0x153   : > { %v1226_v47 = vpack.c.bf16 %v953_v45, %v952_v44  ;;  %v754_v51 = vpop.f32.mrf.mxu0  ;;  %vm924_vm3 = vcmp.ge.f32.partialorder %v800_v41, 0.0  ;;  %v849_v59 = vadd.f32 %v848_v50, %v294_v26 }
 0x154   : > { %v806_v52 = vadd.f32 %v805_v25, %v753_v46  ;;  %v755_v53 = vadd.f32 %v754_v51, %v1817_v37  ;;  %vm925_vm4 = vcmp.ge.f32.partialorder %v802_v49, 0.0  ;;  %v941_v55 = vmul.f32 0.01, %v802_v49  ;;  %v850_v56 = vpop.f32.mrf.mxu1 }
 0x155   : > { %1016 = vst [vmem:[%s1825_s11] sm:$0xff] %v1226_v47  ;;  %v756_v57 = vpop.f32.mrf.mxu0  ;;  %v956_v61 = vsel %vm924_vm3, %v800_v41, %v940_v48  ;;  %v851_v11 = vadd.f32 %v850_v56, %v294_v26 }
 0x156   : > { %v944_v58 = vmul.f32 0.01, %v806_v52  ;;  %v808_v60 = vadd.f32 %v807_v27, %v755_v53  ;;  %v957_v62 = vsel %vm925_vm4, %v802_v49, %v941_v55  ;;  %vm928_vm5 = vcmp.ge.f32.partialorder %v806_v52, 0.0  ;;  %v852_v1 = vpop.f32.mrf.mxu1 }
 0x157   : > { %v757_v63 = vadd.f32 %v756_v57, %v1823_v54  ;;  %v758_v2 = vpop.f32.mrf.mxu0  ;;  %v1228_v3 = vpack.c.bf16 %v957_v62, %v956_v61  ;;  %v853_v21 = vadd.f32 %v852_v1, %v1814_v30 }
 0x158   : > { %vm929_vm6 = vcmp.ge.f32.partialorder %v808_v60, 0.0  ;;  %v945_v4 = vmul.f32 0.01, %v808_v60  ;;  %v759_v6 = vadd.f32 %v758_v2, %v1823_v54  ;;  %v854_v7 = vpop.f32.mrf.mxu1  ;;  %v960_v9 = vsel %vm928_vm5, %v806_v52, %v944_v58 }
 0x159   : > { %v810_v5 = vadd.f32 %v809_v13, %v757_v63  ;;  %v901_v8 = vpop.f32.mrf.mxu0  ;;  %1018 = vst [vmem:[%s1825_s11 + $0x10] sm:$0xff] %v1228_v3  ;;  %v855_v25 = vadd.f32 %v854_v7, %v1814_v30 }
 0x15a   : > { %v961_v10 = vsel %vm929_vm6, %v808_v60, %v945_v4  ;;  %v902_v12 = vadd.f32 %v901_v8, %v849_v59  ;;  %v812_v16 = vadd.f32 %v811_v39, %v759_v6  ;;  %v858_v17 = vpop.f32.mrf.mxu1 }
 0x15b   : > { %v1230_v14 = vpack.c.bf16 %v961_v10, %v960_v9  ;;  %v948_v15 = vmul.f32 0.01, %v810_v5  ;;  %v903_v18 = vpop.f32.mrf.mxu0  ;;  %vm932_vm7 = vcmp.ge.f32.partialorder %v810_v5, 0.0  ;;  %v859_v26 = vadd.f32 %v858_v17, %v1817_v37 }
 0x15c   : > { %v938_v19 = vmul.f32 0.01, %v902_v12  ;;  %v904_v20 = vadd.f32 %v903_v18, %v851_v11  ;;  %vm933_vm8 = vcmp.ge.f32.partialorder %v812_v16, 0.0  ;;  %v949_v22 = vmul.f32 0.01, %v812_v16  ;;  %v860_v23 = vpop.f32.mrf.mxu1 }
 0x15d   : > { %1020 = vst [vmem:[%s1825_s11 + $0x20] sm:$0xff] %v1230_v14  ;;  %vm922_vm9 = vcmp.ge.f32.partialorder %v902_v12, 0.0  ;;  %v905_v24 = vpop.f32.mrf.mxu0  ;;  %v964_v28 = vsel %vm932_vm7, %v810_v5, %v948_v15  ;;  %v861_v30 = vadd.f32 %v860_v23, %v1817_v37 }
 0x15e   : > { %vm923_vm10 = vcmp.ge.f32.partialorder %v904_v20, 0.0  ;;  %v939_v27 = vmul.f32 0.01, %v904_v20  ;;  %v965_v29 = vsel %vm933_vm8, %v812_v16, %v949_v22  ;;  %v906_v31 = vadd.f32 %v905_v24, %v853_v21  ;;  %v862_v13 = vpop.f32.mrf.mxu1 }
 0x15f   : > { %v907_v32 = vpop.f32.mrf.mxu0  ;;  %v1232_v0 = vpack.c.bf16 %v965_v29, %v964_v28  ;;  %v954_v33 = vsel %vm922_vm9, %v902_v12, %v938_v19  ;;  %v863_v42 = vadd.f32 %v862_v13, %v1823_v54 }
 0x160   : > { %v955_v34 = vsel %vm923_vm10, %v904_v20, %v939_v27  ;;  %v908_v35 = vadd.f32 %v907_v32, %v855_v25  ;;  %vm926_vm11 = vcmp.ge.f32.partialorder %v906_v31, 0.0  ;;  %v942_v38 = vmul.f32 0.01, %v906_v31  ;;  %v864_v43 = vpop.f32.mrf.mxu1 }
 0x161   : > { %v1227_v36 = vpack.c.bf16 %v955_v34, %v954_v33  ;;  %v911_v39 = vpop.f32.mrf.mxu0  ;;  %1022 = vst [vmem:[%s1825_s11 + $0x30] sm:$0xff] %v1232_v0  ;;  %v865_v37 = vadd.f32 %v864_v43, %v1823_v54 }
 0x162   : > { %vm927_vm12 = vcmp.ge.f32.partialorder %v908_v35, 0.0  ;;  %v943_v40 = vmul.f32 0.01, %v908_v35  ;;  %v912_v41 = vadd.f32 %v911_v39, %v859_v26  ;;  %v958_v45 = vsel %vm926_vm11, %v906_v31, %v942_v38 }
 0x163   : > { %1017 = vst [vmem:[%s1825_s11 + $0x8] sm:$0xff] %v1227_v36  ;;  %v913_v44 = vpop.f32.mrf.mxu0 }
 0x164   : > { %v959_v46 = vsel %vm927_vm12, %v908_v35, %v943_v40  ;;  %v946_v47 = vmul.f32 0.01, %v912_v41  ;;  %v914_v48 = vadd.f32 %v913_v44, %v861_v30  ;;  %vm930_vm13 = vcmp.ge.f32.partialorder %v912_v41, 0.0 }
 0x165   : > { %v1229_v49 = vpack.c.bf16 %v959_v46, %v958_v45  ;;  %v915_v50 = vpop.f32.mrf.mxu0 }
 0x166   : > { %vm931_vm14 = vcmp.ge.f32.partialorder %v914_v48, 0.0  ;;  %v947_v51 = vmul.f32 0.01, %v914_v48  ;;  %v916_v52 = vadd.f32 %v915_v50, %v863_v42  ;;  %v962_v55 = vsel %vm930_vm13, %v912_v41, %v946_v47 }
 0x167   : > { %1019 = vst [vmem:[%s1825_s11 + $0x18] sm:$0xff] %v1229_v49  ;;  %v917_v53 = vpop.f32.mrf.mxu0 }
 0x168   : > { %v963_v56 = vsel %vm931_vm14, %v914_v48, %v947_v51  ;;  %v950_v57 = vmul.f32 0.01, %v916_v52  ;;  %v918_v58 = vadd.f32 %v917_v53, %v865_v37  ;;  %vm934_vm15 = vcmp.ge.f32.partialorder %v916_v52, 0.0 }
 0x169   : > { %v1231_v59 = vpack.c.bf16 %v963_v56, %v962_v55 }
 0x16a   : > { %vm935_vm0 = vcmp.ge.f32.partialorder %v918_v58, 0.0  ;;  %v951_v60 = vmul.f32 0.01, %v918_v58  ;;  %v966_v54 = vsel %vm934_vm15, %v916_v52, %v950_v57 }
 0x16b   : > { %1021 = vst [vmem:[%s1825_s11 + $0x28] sm:$0xff] %v1231_v59 }
 0x16c   : > { %v967_v61 = vsel %vm935_vm0, %v918_v58, %v951_v60 }
 0x16d   : > { %v1233_v62 = vpack.c.bf16 %v967_v61, %v966_v54 }
 0x16f   : > { %1023 = vst [vmem:[%s1825_s11 + $0x38] sm:$0xff] %v1233_v62 }
 0x170   : > { %1488 = shalt.err (!%p1485_p10)
}
 0x171   : > { %s1489_s9 = scalar_lea.hbm %s1849_s5, 1024  ;;  %s1493_s22 = scalar_lea.hbm %s1895_s3, 4096 }
 0x172   : > { %p1490_p5 = scmp.ne.s32.totalorder %s1849_s5, %s1489_s9  ;;  %p1494_p4 = scmp.lt.s32.totalorder %s1849_s5, %s1895_s3 }
 0x173   : > { %p1495_p13 = scmp.lt.s32.totalorder %s1493_s22, %s1489_s9 }
 0x174   : > { %p1491_p11 = pnand %p1490_p5, %p1911_p2 }
 0x175   : > { %p1496_p1 = por %p1495_p13, %p1494_p4 }
 0x176   : > { %p1492_p6 = pneg %p1491_p11 }
 0x178   : > { %p1497_p12 = pnand %p1496_p1, %p1492_p6 }
 0x17a   : > { %1500 = shalt.err (!%p1497_p12)
}
 0x17b   : > { %s1554_s10 = smov 256   ;;  %s1555_s11 = smov 1024  }
 0x17c   : > { %s1556_s19 = smov 16  }
 0x17d   : > { %1243 = dma.vmem_to_hbm [thread:$0]  (%p1911_p2), %s1843_s17, 1024, %s1849_s5, %s1025_s6, %s1554_s10, %s1555_s11, %s1556_s19  }
 0x17e PF: > { %p1260_p0 = scmp.ge.s32.totalorder %s1543_s15, 2  ;;  %s1053_s27 = sand.u32 1, %s1531_s12  }
 0x17f   : > { %p1912_p3 = scmp.ne.s32.totalorder %s1903_s25, 0  ;;  %s1054_s28 = scalar_lea.sflag [#allocation4], %s1053_s27 }
 0x181   : > { %p1254_p7 = pnand %p1260_p0, %p1912_p3 }
 0x183   : > { %p1255_p8 = pneg %p1254_p7 }
 0x185   : > { %1526 = dma.done.wait (%p1255_p8), %s1054_s28, 1024  }
 0x186   : > { %1528 = vsyncadd (%p1255_p8), %s1054_s28, 4294966272  ;;  %p17_p9 = scmp.ge.s32.totalorder %s1602_s18, 6   ;;  %s1913_s12 = smov %s1535_s13 }
 0x187   : > { %s1914_s13 = smov %s1539_s14  ;;  %s1915_s14 = smov %s1614_s21 }
 0x188   : > { %s1916_s15 = smov %s1602_s18  ;;  %19 = sbr.rel (!%p17_p9) target bundleno = 6 (0x6), region = 81 }
 0x18d   :  { %1059 = vsyncpa [#allocation3], 1 }
 0x18e   :  { %1061 = vsyncpa [#allocation3 + $0x1], 1 }
 0x18f   :  { %1062 = vsyncpa [#allocation6], 1 }
 0x190   :  { %1063 = vsyncpa [#allocation4], 1 }
 0x191   :  { %1065 = vsyncpa [#allocation4 + $0x1], 1 }

</bundles_post_ra>
